<compile_context>
chip_gen: v6e
topology: v6e:2x2x1
jax: 0.10.0
libtpu: 0.0.40
codegen_flags: <defaults>
</compile_context>

<pallas_src>
import functools
import math

import jax
import jax.numpy as jnp
from jax import lax
from jax.experimental import pallas as pl
from jax.experimental.pallas import tpu as pltpu


# ---------------------------------------------------------------------------
# Kernel A: fused Q/K/V input projections (bf16 MXU, f32 accumulation).
# ---------------------------------------------------------------------------
def _qkv_proj_kernel(q_ref, k_ref, v_ref,
                     wqt_ref, bq_ref, wkt_ref, bk_ref, wvt_ref, bv_ref,
                     qp_ref, kp_ref, vp_ref,
                     *, scale: float):
    """Grid = (batch, row_tile).

    q/k/v_ref : (1, tm, D) bf16 token tiles
    w*t_ref   : (D, D)     pre-transposed bf16 weights (y = x @ Wt)
    b*_ref    : (1, D)     f32 biases
    *p_ref    : (1, tm, D) bf16 projected outputs (Q pre-scaled by 1/sqrt(Dh))
    """
    qp = jnp.dot(q_ref[0], wqt_ref[...],
                 preferred_element_type=jnp.float32) + bq_ref[0]
    qp_ref[0] = (qp * scale).astype(qp_ref.dtype)      # fold 1/sqrt(Dh) into Q

    kp = jnp.dot(k_ref[0], wkt_ref[...],
                 preferred_element_type=jnp.float32) + bk_ref[0]
    kp_ref[0] = kp.astype(kp_ref.dtype)

    vp = jnp.dot(v_ref[0], wvt_ref[...],
                 preferred_element_type=jnp.float32) + bv_ref[0]
    vp_ref[0] = vp.astype(vp_ref.dtype)


# ---------------------------------------------------------------------------
# Kernel B: flash attention over pre-projected Q/K/V + fused output projection.
# ---------------------------------------------------------------------------
def _flash_attn_kernel(qp_ref, kp_ref, vp_ref, wot_ref, bo_ref,
                       o_ref,
                       m_s, l_s, acc_s,
                       *, n_heads: int):
    """Grid = (batch, q_tile, kv_tile); kv_tile is the reduction axis.

    qp_ref          : (1, tq, D) bf16 projected & scaled Q tile
    kp_ref, vp_ref  : (1, tk, D) bf16 projected K/V tiles
    wot_ref         : (D, D)     bf16 pre-transposed output-projection weight
    bo_ref          : (1, D)     f32 output-projection bias
    o_ref           : (1, tq, D) output tile (resident across the kv axis)
    m_s, l_s        : (H, tq, 1) f32 online-softmax state
    acc_s           : (H, tq, Dh) f32 context accumulator
    """
    j = pl.program_id(2)
    n_kv = pl.num_programs(2)

    H = n_heads
    _, tq, Dh = acc_s.shape

    @pl.when(j == 0)
    def _init():
        m_s[...] = jnp.full_like(m_s, -jnp.inf)
        l_s[...] = jnp.zeros_like(l_s)
        acc_s[...] = jnp.zeros_like(acc_s)

    qp = qp_ref[0]                                      # (tq, D) bf16, pre-scaled
    kp = kp_ref[0]                                      # (tk, D) bf16
    vp = vp_ref[0]                                      # (tk, D) bf16

    # ---- per-head online softmax. Each head's (tq, tk) intermediates die
    #      right after the write into its disjoint scratch slab.
    # TODO(synk): optional `mask` argument of the PyTorch forward is not
    # supported (mask=None path only).
    for h in range(H):
        sl = slice(h * Dh, (h + 1) * Dh)
        qh = qp[:, sl]                                  # (tq, Dh)
        kh = kp[:, sl]                                  # (tk, Dh)
        vh = vp[:, sl]                                  # (tk, Dh)

        # scores = qh @ kh.T (contract last dims; no XLU transpose)
        s = lax.dot_general(qh, kh, (((1,), (1,)), ((), ())),
                            preferred_element_type=jnp.float32)    # (tq, tk)

        m_prev = m_s[h]                                 # (tq, 1)
        m_new = jnp.maximum(m_prev, jnp.max(s, axis=-1, keepdims=True))
        alpha = jnp.exp(m_prev - m_new)                 # (tq, 1)
        p = jnp.exp(s - m_new)                          # (tq, tk)

        l_s[h] = alpha * l_s[h] + jnp.sum(p, axis=-1, keepdims=True)
        acc_s[h] = alpha * acc_s[h] + jnp.dot(
            p.astype(jnp.bfloat16), vh, preferred_element_type=jnp.float32)
        m_s[h] = m_new

    # ---- finalize: normalize (exact reciprocal, once per q-tile), concat
    #      heads, fused output projection.
    @pl.when(j == n_kv - 1)
    def _finalize():
        ctx = jnp.concatenate(
            [acc_s[h] * (1.0 / l_s[h]) for h in range(H)], axis=-1)  # (tq, D)
        out = jnp.dot(ctx.astype(jnp.bfloat16), wot_ref[...],
                      preferred_element_type=jnp.float32) + bo_ref[0]
        o_ref[0] = out.astype(o_ref.dtype)


# ---------------------------------------------------------------------------
# Host wrapper.
# ---------------------------------------------------------------------------
def _pick_tile(seq_len: int, target: int) -> int:
    """Largest divisor of seq_len that is a multiple of 8 and <= target.

    Falls back to the full seq_len (full-dim blocks always satisfy the (8,128)
    rule) only when no such divisor exists.
    """
    if seq_len <= target:
        return seq_len
    for cand in range(min(target, seq_len), 7, -1):
        if cand % 8 == 0 and seq_len % cand == 0:
            return cand
    return seq_len


def _vmem_budget_bytes() -> int:
    """Chip-aware scoped-VMEM cap: ~48 MiB on 64 MiB chips, ~100 MiB on 128 MiB."""
    try:
        cap = int(pltpu.get_tpu_info().vmem_capacity_bytes)
    except Exception:
        cap = 64 * 1024 * 1024          # conservative fallback (v7x-sized)
    return min(cap - 16 * 1024 * 1024, 100 * 1024 * 1024)


def multi_head_attention(q, k, v, params, n_heads, *,
                         block_q=256, block_k=512, block_m=256):
    """q, k, v: (B, S, D). params: PyTorch-style [out, in] weights + (1, D) biases."""
    B, S, D = q.shape
    assert D % n_heads == 0
    dh = D // n_heads
    out_dtype = q.dtype

    tq = _pick_tile(S, block_q)
    tk = _pick_tile(S, block_k)
    tm = _pick_tile(S, block_m)

    # Host-side prep: bf16 activations, [in, out] bf16 weights (y = x @ Wt).
    q_b = q.astype(jnp.bfloat16)
    k_b = k.astype(jnp.bfloat16)
    v_b = v.astype(jnp.bfloat16)
    wq_t = params["wq"].T.astype(jnp.bfloat16)
    wk_t = params["wk"].T.astype(jnp.bfloat16)
    wv_t = params["wv"].T.astype(jnp.bfloat16)
    wo_t = params["wo"].T.astype(jnp.bfloat16)
    bq, bk, bv, bo = params["bq"], params["bk"], params["bv"], params["bo"]

    vmem_cap = _vmem_budget_bytes()

    # ---------------- kernel A: Q/K/V projections (done exactly once). -------
    row_spec = pl.BlockSpec((1, tm, D), lambda b, i: (b, i, 0))
    w2_spec = pl.BlockSpec((D, D), lambda b, i: (0, 0))
    b2_spec = pl.BlockSpec((1, D), lambda b, i: (0, 0))

    proj_est = (3 * 2 * tm * D * 2          # bf16 input tiles (double-buffered)
                + 3 * 2 * tm * D * 2        # bf16 output tiles (double-buffered)
                + 3 * 2 * D * D * 2         # bf16 weights (double-buffered)
                + 3 * 2 * D * 4             # f32 biases
                + 3 * tm * max(D, 128) * 4) # live f32 accumulation temporaries
    proj_vmem = int(min(vmem_cap, max(16 * 1024 * 1024, 2 * proj_est)))

    qp, kp, vp = pl.pallas_call(
        functools.partial(_qkv_proj_kernel, scale=1.0 / math.sqrt(dh)),
        out_shape=(jax.ShapeDtypeStruct((B, S, D), jnp.bfloat16),
                   jax.ShapeDtypeStruct((B, S, D), jnp.bfloat16),
                   jax.ShapeDtypeStruct((B, S, D), jnp.bfloat16)),
        grid_spec=pltpu.PrefetchScalarGridSpec(
            num_scalar_prefetch=0,
            grid=(B, S // tm),
            in_specs=[row_spec, row_spec, row_spec,
                      w2_spec, b2_spec,    # W_q^T, b_q
                      w2_spec, b2_spec,    # W_k^T, b_k
                      w2_spec, b2_spec],   # W_v^T, b_v
            out_specs=[row_spec, row_spec, row_spec],
        ),
        compiler_params=pltpu.CompilerParams(
            dimension_semantics=("parallel", "parallel"),
            vmem_limit_bytes=proj_vmem,
        ),
    )(q_b, k_b, v_b, wq_t, bq, wk_t, bk, wv_t, bv)

    # ---------------- kernel B: flash attention + output projection. ---------
    q_spec = pl.BlockSpec((1, tq, D), lambda b, i, j: (b, i, 0))
    kv_spec = pl.BlockSpec((1, tk, D), lambda b, i, j: (b, j, 0))
    w_spec = pl.BlockSpec((D, D), lambda b, i, j: (0, 0))
    bias_spec = pl.BlockSpec((1, D), lambda b, i, j: (0, 0))
    o_spec = pl.BlockSpec((1, tq, D), lambda b, i, j: (b, i, 0))

    attn_est = (2 * tq * D * 2              # bf16 Q tile (double-buffered)
                + 2 * 2 * tk * D * 2        # bf16 K/V tiles (double-buffered)
                + 2 * D * D * 2             # bf16 Wo (double-buffered)
                + 2 * D * 4                 # f32 bias
                + 2 * tq * D * 4            # f32 output tile (double-buffered)
                + 2 * n_heads * tq * 128 * 4          # m/l scratch (lane padded)
                + n_heads * tq * max(dh, 128) * 4     # acc scratch (lane padded)
                + 4 * tq * tk * 4)          # live per-head score/prob tiles
    attn_vmem = int(min(vmem_cap, max(16 * 1024 * 1024, 2 * attn_est)))

    out = pl.pallas_call(
        functools.partial(_flash_attn_kernel, n_heads=n_heads),
        out_shape=jax.ShapeDtypeStruct((B, S, D), out_dtype),
        grid_spec=pltpu.PrefetchScalarGridSpec(
            num_scalar_prefetch=0,
            grid=(B, S // tq, S // tk),
            in_specs=[q_spec, kv_spec, kv_spec, w_spec, bias_spec],
            out_specs=o_spec,
            scratch_shapes=[
                pltpu.VMEM((n_heads, tq, 1), jnp.float32),    # m (running max)
                pltpu.VMEM((n_heads, tq, 1), jnp.float32),    # l (running denom)
                pltpu.VMEM((n_heads, tq, dh), jnp.float32),   # context accumulator
            ],
        ),
        compiler_params=pltpu.CompilerParams(
            dimension_semantics=("parallel", "parallel", "arbitrary"),
            vmem_limit_bytes=attn_vmem,
        ),
    )(qp, kp, vp, wo_t, bo)

    return out


# ---------------------------------------------------------------------------
# Pure-JAX reference + test harness.
# ---------------------------------------------------------------------------
def _reference_mha(q, k, v, params, n_heads):
    """Plain-JAX f32 reference matching the PyTorch module semantics."""
    B, S, D = q.shape
    Dh = D // n_heads

    def lin(x, w, b):
        return x @ w.T + b[0]

    qp = lin(q, params["wq"], params["bq"])
    kp = lin(k, params["wk"], params["bk"])
    vp = lin(v, params["wv"], params["bv"])

    def split(t):  # (B,S,D) -> (B,H,S,Dh)
        return t.reshape(B, S, n_heads, Dh).transpose(0, 2, 1, 3)

    qh, kh, vh = split(qp), split(kp), split(vp)
    scores = jnp.einsum("bhqd,bhkd->bhqk", qh, kh) / math.sqrt(Dh)
    attn = jax.nn.softmax(scores, axis=-1)
    out = jnp.einsum("bhqk,bhkd->bhqd", attn, vh)
    out = out.transpose(0, 2, 1, 3).reshape(B, S, D)   # concat heads
    return lin(out, params["wo"], params["bo"])


def _init_params(key, d_model):
    # PyTorch nn.Linear-style init: U(-1/sqrt(in), 1/sqrt(in)).
    bound = 1.0 / math.sqrt(d_model)
    keys = jax.random.split(key, 8)

    def u(k, shape):
        return jax.random.uniform(k, shape, jnp.float32, -bound, bound)

    return {
        "wq": u(keys[0], (d_model, d_model)), "bq": u(keys[1], (1, d_model)),
        "wk": u(keys[2], (d_model, d_model)), "bk": u(keys[3], (1, d_model)),
        "wv": u(keys[4], (d_model, d_model)), "bv": u(keys[5], (1, d_model)),
        "wo": u(keys[6], (d_model, d_model)), "bo": u(keys[7], (1, d_model)),
    }


if __name__ == "__main__":
    B, S, D, H = 2, 16, 32, 4

    key = jax.random.PRNGKey(0)
    kq, kk, kv, kp = jax.random.split(key, 4)
    q = jax.random.normal(kq, (B, S, D), jnp.float32)
    k = jax.random.normal(kk, (B, S, D), jnp.float32)
    v = jax.random.normal(kv, (B, S, D), jnp.float32)
    params = _init_params(kp, D)

    # Small tiles so the flash (multi kv-step) path is actually exercised.
    out = multi_head_attention(q, k, v, params, H,
                               block_q=8, block_k=8, block_m=8)
    out = jax.block_until_ready(out)

    ref = _reference_mha(q, k, v, params, H)
    assert out.shape == (B, S, D)
    # bf16 MXU matmuls -> looser tolerance than pure f32.
    assert jnp.allclose(out, ref, rtol=2e-2, atol=2e-2), "mismatch vs reference"

    print("KERNEL_OK")
</pallas_src>

<mosaic_0001>
module attributes {stable_mosaic.version = 11 : i64} {
  func.func @_qkv_proj_kernel(%arg0: i32, %arg1: i32, %arg2: memref<1x8x32xbf16, #tpu.memory_space<vmem>>, %arg3: memref<1x8x32xbf16, #tpu.memory_space<vmem>>, %arg4: memref<1x8x32xbf16, #tpu.memory_space<vmem>>, %arg5: memref<32x32xbf16, #tpu.memory_space<vmem>>, %arg6: memref<1x32xf32, #tpu.memory_space<vmem>>, %arg7: memref<32x32xbf16, #tpu.memory_space<vmem>>, %arg8: memref<1x32xf32, #tpu.memory_space<vmem>>, %arg9: memref<32x32xbf16, #tpu.memory_space<vmem>>, %arg10: memref<1x32xf32, #tpu.memory_space<vmem>>, %arg11: memref<1x8x32xbf16, #tpu.memory_space<vmem>>, %arg12: memref<1x8x32xbf16, #tpu.memory_space<vmem>>, %arg13: memref<1x8x32xbf16, #tpu.memory_space<vmem>>) attributes {dimension_semantics = [#tpu.dimension_semantics<parallel>, #tpu.dimension_semantics<parallel>], iteration_bounds = array<i64: 2, 2>, scalar_prefetch = 0 : i64, scratch_operands = 0 : i64, tpu.core_type = #tpu.core_type<tc>, window_params = [{transform_indices = @transform_0, window_bounds = array<i64: 1, 8, 32>}, {transform_indices = @transform_1, window_bounds = array<i64: 1, 8, 32>}, {transform_indices = @transform_2, window_bounds = array<i64: 1, 8, 32>}, {pipeline_mode = #tpu.pipeline_mode<synchronous>, transform_indices = @transform_3, window_bounds = array<i64: 32, 32>}, {pipeline_mode = #tpu.pipeline_mode<synchronous>, transform_indices = @transform_4, window_bounds = array<i64: 1, 32>}, {pipeline_mode = #tpu.pipeline_mode<synchronous>, transform_indices = @transform_5, window_bounds = array<i64: 32, 32>}, {pipeline_mode = #tpu.pipeline_mode<synchronous>, transform_indices = @transform_6, window_bounds = array<i64: 1, 32>}, {pipeline_mode = #tpu.pipeline_mode<synchronous>, transform_indices = @transform_7, window_bounds = array<i64: 32, 32>}, {pipeline_mode = #tpu.pipeline_mode<synchronous>, transform_indices = @transform_8, window_bounds = array<i64: 1, 32>}, {transform_indices = @transform_9, window_bounds = array<i64: 1, 8, 32>}, {transform_indices = @transform_10, window_bounds = array<i64: 1, 8, 32>}, {transform_indices = @transform_11, window_bounds = array<i64: 1, 8, 32>}]} {
    %c0 = arith.constant 0 : index
    %c0_0 = arith.constant 0 : index
    %c0_1 = arith.constant 0 : index
    %0 = vector.load %arg2[%c0, %c0_0, %c0_1] : memref<1x8x32xbf16, #tpu.memory_space<vmem>>, vector<1x8x32xbf16>
    %1 = vector.shape_cast %0 : vector<1x8x32xbf16> to vector<8x32xbf16>
    %c0_2 = arith.constant 0 : index
    %c0_3 = arith.constant 0 : index
    %2 = vector.load %arg5[%c0_2, %c0_3] : memref<32x32xbf16, #tpu.memory_space<vmem>>, vector<32x32xbf16>
    %cst = arith.constant dense<0.000000e+00> : vector<8x32xf32>
    %3 = tpu.matmul %1, %2, %cst {dimension_numbers = #tpu.dot_dimension_numbers<[1], [0], [0], [1], [0, 0, 1, 1], [], []>} : vector<8x32xbf16>, vector<32x32xbf16>, vector<8x32xf32> -> vector<8x32xf32>
    %c0_4 = arith.constant 0 : index
    %c0_5 = arith.constant 0 : index
    %4 = vector.load %arg6[%c0_4, %c0_5] : memref<1x32xf32, #tpu.memory_space<vmem>>, vector<1x32xf32>
    %5 = vector.shape_cast %4 : vector<1x32xf32> to vector<32xf32>
    %6 = vector.shape_cast %5 : vector<32xf32> to vector<1x32xf32>
    %7 = vector.broadcast %6 : vector<1x32xf32> to vector<8x32xf32>
    %8 = arith.addf %3, %7 : vector<8x32xf32>
    %cst_6 = arith.constant 0.353553385 : f32
    %9 = vector.broadcast %cst_6 : f32 to vector<8x32xf32>
    %10 = arith.mulf %8, %9 : vector<8x32xf32>
    %11 = arith.truncf %10 : vector<8x32xf32> to vector<8x32xbf16>
    %c0_7 = arith.constant 0 : index
    %c0_8 = arith.constant 0 : index
    %c0_9 = arith.constant 0 : index
    %12 = vector.load %arg11[%c0_7, %c0_8, %c0_9] : memref<1x8x32xbf16, #tpu.memory_space<vmem>>, vector<1x8x32xbf16>
    %13 = vector.shape_cast %12 : vector<1x8x32xbf16> to vector<8x32xbf16>
    %14 = vector.shape_cast %11 : vector<8x32xbf16> to vector<1x8x32xbf16>
    tpu.vector_store %arg11[%c0_7, %c0_8, %c0_9], %14 {strides = array<i32>} : memref<1x8x32xbf16, #tpu.memory_space<vmem>>, vector<1x8x32xbf16>,
    %c0_10 = arith.constant 0 : index
    %c0_11 = arith.constant 0 : index
    %c0_12 = arith.constant 0 : index
    %15 = vector.load %arg3[%c0_10, %c0_11, %c0_12] : memref<1x8x32xbf16, #tpu.memory_space<vmem>>, vector<1x8x32xbf16>
    %16 = vector.shape_cast %15 : vector<1x8x32xbf16> to vector<8x32xbf16>
    %c0_13 = arith.constant 0 : index
    %c0_14 = arith.constant 0 : index
    %17 = vector.load %arg7[%c0_13, %c0_14] : memref<32x32xbf16, #tpu.memory_space<vmem>>, vector<32x32xbf16>
    %cst_15 = arith.constant dense<0.000000e+00> : vector<8x32xf32>
    %18 = tpu.matmul %16, %17, %cst_15 {dimension_numbers = #tpu.dot_dimension_numbers<[1], [0], [0], [1], [0, 0, 1, 1], [], []>} : vector<8x32xbf16>, vector<32x32xbf16>, vector<8x32xf32> -> vector<8x32xf32>
    %c0_16 = arith.constant 0 : index
    %c0_17 = arith.constant 0 : index
    %19 = vector.load %arg8[%c0_16, %c0_17] : memref<1x32xf32, #tpu.memory_space<vmem>>, vector<1x32xf32>
    %20 = vector.shape_cast %19 : vector<1x32xf32> to vector<32xf32>
    %21 = vector.shape_cast %20 : vector<32xf32> to vector<1x32xf32>
    %22 = vector.broadcast %21 : vector<1x32xf32> to vector<8x32xf32>
    %23 = arith.addf %18, %22 : vector<8x32xf32>
    %24 = arith.truncf %23 : vector<8x32xf32> to vector<8x32xbf16>
    %c0_18 = arith.constant 0 : index
    %c0_19 = arith.constant 0 : index
    %c0_20 = arith.constant 0 : index
    %25 = vector.load %arg12[%c0_18, %c0_19, %c0_20] : memref<1x8x32xbf16, #tpu.memory_space<vmem>>, vector<1x8x32xbf16>
    %26 = vector.shape_cast %25 : vector<1x8x32xbf16> to vector<8x32xbf16>
    %27 = vector.shape_cast %24 : vector<8x32xbf16> to vector<1x8x32xbf16>
    tpu.vector_store %arg12[%c0_18, %c0_19, %c0_20], %27 {strides = array<i32>} : memref<1x8x32xbf16, #tpu.memory_space<vmem>>, vector<1x8x32xbf16>,
    %c0_21 = arith.constant 0 : index
    %c0_22 = arith.constant 0 : index
    %c0_23 = arith.constant 0 : index
    %28 = vector.load %arg4[%c0_21, %c0_22, %c0_23] : memref<1x8x32xbf16, #tpu.memory_space<vmem>>, vector<1x8x32xbf16>
    %29 = vector.shape_cast %28 : vector<1x8x32xbf16> to vector<8x32xbf16>
    %c0_24 = arith.constant 0 : index
    %c0_25 = arith.constant 0 : index
    %30 = vector.load %arg9[%c0_24, %c0_25] : memref<32x32xbf16, #tpu.memory_space<vmem>>, vector<32x32xbf16>
    %cst_26 = arith.constant dense<0.000000e+00> : vector<8x32xf32>
    %31 = tpu.matmul %29, %30, %cst_26 {dimension_numbers = #tpu.dot_dimension_numbers<[1], [0], [0], [1], [0, 0, 1, 1], [], []>} : vector<8x32xbf16>, vector<32x32xbf16>, vector<8x32xf32> -> vector<8x32xf32>
    %c0_27 = arith.constant 0 : index
    %c0_28 = arith.constant 0 : index
    %32 = vector.load %arg10[%c0_27, %c0_28] : memref<1x32xf32, #tpu.memory_space<vmem>>, vector<1x32xf32>
    %33 = vector.shape_cast %32 : vector<1x32xf32> to vector<32xf32>
    %34 = vector.shape_cast %33 : vector<32xf32> to vector<1x32xf32>
    %35 = vector.broadcast %34 : vector<1x32xf32> to vector<8x32xf32>
    %36 = arith.addf %31, %35 : vector<8x32xf32>
    %37 = arith.truncf %36 : vector<8x32xf32> to vector<8x32xbf16>
    %c0_29 = arith.constant 0 : index
    %c0_30 = arith.constant 0 : index
    %c0_31 = arith.constant 0 : index
    %38 = vector.load %arg13[%c0_29, %c0_30, %c0_31] : memref<1x8x32xbf16, #tpu.memory_space<vmem>>, vector<1x8x32xbf16>
    %39 = vector.shape_cast %38 : vector<1x8x32xbf16> to vector<8x32xbf16>
    %40 = vector.shape_cast %37 : vector<8x32xbf16> to vector<1x8x32xbf16>
    tpu.vector_store %arg13[%c0_29, %c0_30, %c0_31], %40 {strides = array<i32>} : memref<1x8x32xbf16, #tpu.memory_space<vmem>>, vector<1x8x32xbf16>,
    return
  }
  func.func @transform_0(%arg0: i32, %arg1: i32) -> (i32, i32, i32) {
    %c0_i32 = arith.constant 0 : i32
    %c0_i32_0 = arith.constant 0 : i32
    return %arg0, %arg1, %c0_i32 : i32, i32, i32
  }
  func.func @transform_1(%arg0: i32, %arg1: i32) -> (i32, i32, i32) {
    %c0_i32 = arith.constant 0 : i32
    %c0_i32_0 = arith.constant 0 : i32
    return %arg0, %arg1, %c0_i32 : i32, i32, i32
  }
  func.func @transform_2(%arg0: i32, %arg1: i32) -> (i32, i32, i32) {
    %c0_i32 = arith.constant 0 : i32
    %c0_i32_0 = arith.constant 0 : i32
    return %arg0, %arg1, %c0_i32 : i32, i32, i32
  }
  func.func @transform_3(%arg0: i32, %arg1: i32) -> (i32, i32) {
    %c0_i32 = arith.constant 0 : i32
    %c0_i32_0 = arith.constant 0 : i32
    %c0_i32_1 = arith.constant 0 : i32
    return %c0_i32, %c0_i32_0 : i32, i32
  }
  func.func @transform_4(%arg0: i32, %arg1: i32) -> (i32, i32) {
    %c0_i32 = arith.constant 0 : i32
    %c0_i32_0 = arith.constant 0 : i32
    %c0_i32_1 = arith.constant 0 : i32
    return %c0_i32, %c0_i32_0 : i32, i32
  }
  func.func @transform_5(%arg0: i32, %arg1: i32) -> (i32, i32) {
    %c0_i32 = arith.constant 0 : i32
    %c0_i32_0 = arith.constant 0 : i32
    %c0_i32_1 = arith.constant 0 : i32
    return %c0_i32, %c0_i32_0 : i32, i32
  }
  func.func @transform_6(%arg0: i32, %arg1: i32) -> (i32, i32) {
    %c0_i32 = arith.constant 0 : i32
    %c0_i32_0 = arith.constant 0 : i32
    %c0_i32_1 = arith.constant 0 : i32
    return %c0_i32, %c0_i32_0 : i32, i32
  }
  func.func @transform_7(%arg0: i32, %arg1: i32) -> (i32, i32) {
    %c0_i32 = arith.constant 0 : i32
    %c0_i32_0 = arith.constant 0 : i32
    %c0_i32_1 = arith.constant 0 : i32
    return %c0_i32, %c0_i32_0 : i32, i32
  }
  func.func @transform_8(%arg0: i32, %arg1: i32) -> (i32, i32) {
    %c0_i32 = arith.constant 0 : i32
    %c0_i32_0 = arith.constant 0 : i32
    %c0_i32_1 = arith.constant 0 : i32
    return %c0_i32, %c0_i32_0 : i32, i32
  }
  func.func @transform_9(%arg0: i32, %arg1: i32) -> (i32, i32, i32) {
    %c0_i32 = arith.constant 0 : i32
    %c0_i32_0 = arith.constant 0 : i32
    return %arg0, %arg1, %c0_i32 : i32, i32, i32
  }
  func.func @transform_10(%arg0: i32, %arg1: i32) -> (i32, i32, i32) {
    %c0_i32 = arith.constant 0 : i32
    %c0_i32_0 = arith.constant 0 : i32
    return %arg0, %arg1, %c0_i32 : i32, i32, i32
  }
  func.func @transform_11(%arg0: i32, %arg1: i32) -> (i32, i32, i32) {
    %c0_i32 = arith.constant 0 : i32
    %c0_i32_0 = arith.constant 0 : i32
    return %arg0, %arg1, %c0_i32 : i32, i32, i32
  }
}

</mosaic_0001>

<bundles_post_ra>
// kernel: tpu_custom_call.1
= control target key start
LH: loop header
LB: loop body
LE: loop exit
PB: predicated region body
PF: predicated region fallthrough
CT: control target
= control target key end

     0   :  { %s2047_s0 = inlined_call_operand.hbm [shape: bf16[2,16,32], index: 0, kind: input, shape index: {}]   ;;  %s2048_s1 = inlined_call_operand.hbm [shape: bf16[2,16,32], index: 1, kind: input, shape index: {}]   ;;  %s2049_s2 = inlined_call_operand.hbm [shape: bf16[2,16,32], index: 2, kind: input, shape index: {}]   ;;  %s2050_s3 = inlined_call_operand.hbm [shape: bf16[32,32], index: 3, kind: input, shape index: {}]   ;;  %s2051_s4 = inlined_call_operand.vmem [shape: f32[1,32], index: 4, kind: input, shape index: {}]   ;;  %s2052_s5 = inlined_call_operand.hbm [shape: bf16[32,32], index: 5, kind: input, shape index: {}]   ;;  %s2053_s6 = inlined_call_operand.vmem [shape: f32[1,32], index: 6, kind: input, shape index: {}]   ;;  %s2054_s7 = inlined_call_operand.hbm [shape: bf16[32,32], index: 7, kind: input, shape index: {}]   ;;  %s2055_s8 = inlined_call_operand.vmem [shape: f32[1,32], index: 8, kind: input, shape index: {}]   ;;  %s2056_s9 = inlined_call_operand.hbm [shape: bf16[2,16,32], index: 9, kind: output, shape index: {0}]   ;;  %s2057_s10 = inlined_call_operand.hbm [shape: bf16[2,16,32], index: 10, kind: output, shape index: {1}]   ;;  %s2058_s11 = inlined_call_operand.hbm [shape: bf16[2,16,32], index: 11, kind: output, shape index: {2}]  }
   0x1   :  { %2082 = sst [smem:[#allocation30_spill]] %s2048_s1 }
   0x2   :  { %2083 = sst [smem:[#allocation31_spill]] %s2050_s3 }
   0x3   :  { %2084 = sst [smem:[#allocation32_spill]] %s2052_s5 }
   0x4   :  { %2085 = sst [smem:[#allocation33_spill]] %s2053_s6 }
   0x5   :  { %2086 = sst [smem:[#allocation34_spill]] %s2055_s8 }
   0x6   :  { %2087 = sst [smem:[#allocation35_spill]] %s2056_s9 }
   0x7   :  { %2088 = sst [smem:[#allocation36_spill]] %s2057_s10 }
   0x8   :  { %2089 = sst [smem:[#allocation37_spill]] %s2058_s11 }
   0x9   :  { %17 = vsyncpa [#allocation3], 0 }
   0xa   :  { %19 = vsyncpa [#allocation3 + $0x1], 0 }
   0xb   :  { %20 = vsyncpa [#allocation6], 0 }
   0xc   :  { %22 = vsyncpa [#allocation6 + $0x1], 0 }
   0xd   :  { %23 = vsyncpa [#allocation9], 0 }
   0xe   :  { %24 = vsyncpa [#allocation12], 0 }
   0xf   :  { %25 = vsyncpa [#allocation4], 0 }
  0x10   :  { %27 = vsyncpa [#allocation4 + $0x1], 0 }
  0x11   :  { %28 = vsyncpa [#allocation15], 0 }
  0x12   :  { %30 = vsyncpa [#allocation15 + $0x1], 0  ;;  %s1680_s17 = smov 0   ;;  %s1682_s18 = smov 0  }
  0x13   :  { %s1684_s19 = smov 0   ;;  %s1686_s20 = smov 0  }
  0x14   :  { %s1688_s21 = smov 0   ;;  %s1690_s22 = smov 0  }
  0x15   :  { %s1692_s23 = smov 0   ;;  %s1694_s24 = smov 0  }
  0x16 LB: > { %2090 = sst [smem:[#allocation23_spill]] %s1577_s17  ;;  %s1721_s25 = sadd.s32 4294967295, %s1605_s24   ;;  %s1605_s24 = sphi %s1694_s24, %s36_s24   ;;  %s1601_s23 = sphi %s1692_s23, %s2134_s23   ;;  %s1597_s22 = sphi %s1690_s22, %s2133_s22   ;;  %s1593_s21 = sphi %s1688_s21, %s2132_s21   ;;  %s1589_s20 = sphi %s1686_s20, %s2131_s20   ;;  %s1585_s19 = sphi %s1684_s19, %s2137_s19   ;;  %s1581_s18 = sphi %s1682_s18, %s2136_s18   ;;  %s1577_s17 = sphi %s1680_s17, %s2135_s17  }
  0x17   : > { %2091 = sst [smem:[#allocation24_spill]] %s1597_s22  ;;  %s2059_s26 = sadd.s32 4294967294, %s1605_s24  }
  0x18   : > { %2092 = sst [smem:[#allocation25_spill]] %s1601_s23  ;;  %p70_p0 = scmp.ne.s32.totalorder %s1581_s18, %s1577_s17 }
  0x19   : > { %p2076_p1 = scmp.eq.s32.totalorder %s1721_s25, 0  ;;  %p284_p3 = scmp.eq.s32.totalorder %s2059_s26, 3 }
  0x1a   : > { %p1060_p5 = scmp.ge.s32.totalorder %s1605_s24, 1  ;;  %p347_p7 = scmp.lt.s32.totalorder %s1605_s24, 5 }
  0x1b   : > { %p1732_p4 = por %p2076_p1, %p70_p0  ;;  %p1737_p6 = por %p284_p3, %p70_p0 }
  0x1c   : > { %p1742_p8 = pnand %p1060_p5, %p347_p7  ;;  %s1607_s30 = smov [#allocation8]  }
  0x1d   : > { %s2093_s27 = scalar_select %p1732_p4, 1, 0 }
  0x1e   : > { %s2094_s28 = scalar_select %p1737_p6, 1, 0 }
  0x1f   : > { %s2096_s29 = scalar_select %p1742_p8, 1, 0 }
  0x20   : > { %2095 = sst [smem:[#allocation26_spill]] %s2094_s28  ;;  %s359_s12 = sshll.u32 %s1607_s30, 4  ;;  %s360_s12 = int_to_ptr.vmem [resolvable:$true] %s359_s12 }
  0x21   : > { %p1164_p9 = pneg %p1742_p8  ;;  %s1290_s14 = scalar_lea.vmem %s360_s12, 256 }
  0x22   : > { %p1291_p12 = scmp.ne.s32.totalorder %s360_s12, %s1290_s14  ;;  %p1298_p3 = scmp.lt.s32.totalorder %s360_s12, %s360_s12 }
  0x23   : > { %p1750_p10 = pnand %p1164_p9, %p2076_p1  ;;  %p1299_p5 = scmp.lt.s32.totalorder %s1290_s14, %s1290_s14 }
  0x25   : > { %p2077_p11 = pneg %p1750_p10  ;;  %p1300_p7 = por %p1299_p5, %p1298_p3 }
  0x27   : > { %p1293_p13 = pnand %p1291_p12, %p2077_p11 }
  0x29   : > { %p1294_p0 = pneg %p1293_p13 }
  0x2b   : > { %p1301_p2 = pnand %p1300_p7, %p1294_p0 }
  0x2d   : > { %1304 = shalt.err (!%p1301_p2)
}
  0x2e   : > { %s2063_s15 = smov 64   ;;  %s2065_s16 = smov 4  }
  0x2f   : > { %s2098_s3 = sld [smem:[#allocation31_spill]]  ;;  %s45_s26 = sadd.s32 1, %s1597_s22 }
  0x30   : > { %p46_p2 = scmp.ge.s32.totalorder %s45_s26, 2  ;;  %s48_s28 = sadd.s32 1, %s1601_s23 }
  0x31   : > { %s57_s17 = sadd.s32 1, %s1585_s19  ;;  %p64_p9 = scmp.ne.s32.totalorder %s1585_s19, %s1581_s18 }
  0x32   : > { %s2139_s26 = smov (%p46_p2, %s45_s26), 0  ;;  %s2141_s28 = smov (!%p46_p2, %s48_s28), %s1601_s23 }
  0x33   : > { %2099 = sst [smem:[#allocation27_spill]] %s2139_s26  ;;  %s53_s11 = ssub.s32 %s1597_s22, %s2139_s26 }
  0x34   : > { %p65_p12 = scmp.eq.s32.totalorder %s1605_s24, 0  ;;  %p50_p13 = scmp.ge.s32.totalorder %s2141_s28, 2 }
  0x35   : > { %1167 = dma.hbm_to_vmem [thread:$0]  (!%p1750_p10), %s2098_s3, 256, %s360_s12, [#allocation9], %s2063_s15, %s2063_s15, %s2065_s16  }
  0x36   : > { %p2100_p0 = scmp.eq.s32.totalorder %s1721_s25, 3  ;;  %p66_p5 = por %p65_p12, %p64_p9 }
  0x37   : > { %p1197_p7 = scmp.lt.s32.totalorder %s1605_s24, 4  ;;  %s2143_s28 = smov (%p50_p13, %s2141_s28), 0 }
  0x38   : > { %p1780_p3 = por %p2100_p0, %p64_p9  ;;  %2103 = sst [smem:[#allocation29_spill]] %s2143_s28 }
  0x39   : > { %s2074_s30 = sand.u32 1, %s1585_s19   ;;  %s1066_s14 = sshll.u32 %s1601_s23, 1 }
  0x3a   : > { %s2101_s12 = scalar_select %p1780_p3, 1, 0 }
  0x3b   : > { %s52_s15 = ssub.s32 %s1601_s23, %s2143_s28  ;;  %s1793_s16 = sshll.u32 %s2074_s30, 2 }
  0x3c   : > { %2102 = sst [smem:[#allocation28_spill]] %s2101_s12  ;;  %s54_s3 = sor.u32 %s53_s11, %s52_s15 }
  0x3d   : > { %s417_s26 = sadd.s32 %s1597_s22, %s1066_s14  ;;  %p55_p2 = scmp.eq.s32.totalorder %s54_s3, 0 }
  0x3e   : > { %s1796_s8 = sshll.u32 %s417_s26, 6  ;;  %p1798_p0 = pnand %p1197_p7, %p66_p5 }
  0x3f   : > { %s428_s12 = sand.u32 1, %s1605_s24   ;;  %s2105_s1 = sld [smem:[#allocation30_spill]] }
  0x40   : > { %s1804_s10 = scalar_select %p55_p2, %s1585_s19, %s57_s17  }
  0x41   : > { %s432_s6 = scalar_lea.vmem [#allocation5], %s1793_s16  ;;  %s1610_s3 = smov [#allocation10]  }
  0x42   : > { %s441_s11 = sshll.u32 %s432_s6, 4  ;;  %s375_s26 = sshll.u32 %s1610_s3, 4  ;;  %s442_s11 = int_to_ptr.vmem [resolvable:$true] %s441_s11  ;;  %s376_s26 = int_to_ptr.vmem [resolvable:$true] %s375_s26 }
  0x43   : > { %s1811_s15 = scalar_lea.sflag [#allocation6], %s428_s12  ;;  %p2078_p9 = pneg %p1798_p0 }
  0x44   : > { %s1318_s14 = scalar_lea.vmem %s442_s11, 64  ;;  %s1611_s17 = smov [#allocation5]  }
  0x45   : > { %s439_s30 = scalar_lea.hbm %s2105_s1, %s1796_s8  ;;  %p1319_p12 = scmp.ne.s32.totalorder %s442_s11, %s1318_s14 }
  0x46   : > { %s1323_s22 = sshll.u32 %s1611_s17, 4  ;;  %s1324_s22 = int_to_ptr.vmem [resolvable:$false] %s1323_s22 }
  0x47   : > { %p1321_p13 = pnand %p1319_p12, %p2078_p9  ;;  %s1325_s23 = scalar_lea.vmem %s1324_s22, 128 }
  0x48   : > { %p1326_p7 = scmp.lt.s32.totalorder %s442_s11, %s1324_s22  ;;  %p1327_p2 = scmp.lt.s32.totalorder %s1325_s23, %s1318_s14 }
  0x49   : > { %p1322_p5 = pneg %p1321_p13 }
  0x4a   : > { %p1328_p1 = por %p1327_p2, %p1326_p7 }
  0x4c   : > { %p1329_p11 = pnand %p1328_p1, %p1322_p5 }
  0x4e   : > { %1332 = shalt.err (!%p1329_p11)
}
  0x4f   : > { %1180 = dma.hbm_to_vmem [thread:$0]  (!%p1798_p0), %s439_s30, 64, %s442_s11, %s1811_s15  }
  0x50   : > { %s1344_s6 = scalar_lea.vmem %s376_s26, 256  ;;  %p2106_p12 = pneg %p1750_p10 }
  0x51   : > { %p1345_p6 = scmp.ne.s32.totalorder %s376_s26, %s1344_s6  ;;  %p1352_p3 = scmp.lt.s32.totalorder %s376_s26, %s376_s26 }
  0x52   : > { %p1353_p4 = scmp.lt.s32.totalorder %s1344_s6, %s1344_s6 }
  0x53   : > { %p1347_p13 = pnand %p1345_p6, %p2106_p12 }
  0x54   : > { %p1354_p8 = por %p1353_p4, %p1352_p3 }
  0x55   : > { %p1348_p9 = pneg %p1347_p13 }
  0x57   : > { %p1355_p2 = pnand %p1354_p8, %p1348_p9 }
  0x59   : > { %1358 = shalt.err (!%p1355_p2)
}
  0x5a   : > { %s2107_s22 = smov 4   ;;  %s2108_s28 = smov 64  }
  0x5b   : > { %s2109_s5 = sld [smem:[#allocation32_spill]]  ;;  %s1612_s30 = smov [#allocation11]  }
  0x5c   : > { %s391_s11 = sshll.u32 %s1612_s30, 4  ;;  %p2110_p6 = pmov %p2106_p12  ;;  %s392_s11 = int_to_ptr.vmem [resolvable:$true] %s391_s11 }
  0x5d   : > { %s1370_s14 = scalar_lea.vmem %s392_s11, 256  ;;  %p1378_p11 = scmp.lt.s32.totalorder %s392_s11, %s392_s11 }
  0x5e   : > { %p1371_p1 = scmp.ne.s32.totalorder %s392_s11, %s1370_s14  ;;  %p1379_p3 = scmp.lt.s32.totalorder %s1370_s14, %s1370_s14 }
  0x60   : > { %p1373_p4 = pnand %p1371_p1, %p2110_p6  ;;  %p1380_p9 = por %p1379_p3, %p1378_p11 }
  0x61   : > { %1170 = dma.hbm_to_vmem [thread:$0]  (!%p1750_p10), %s2109_s5, 256, %s376_s26, [#allocation9], %s2108_s28, %s2108_s28, %s2107_s22  }
  0x62   : > { %p1374_p8 = pneg %p1373_p4 }
  0x64   : > { %p1381_p5 = pnand %p1380_p9, %p1374_p8 }
  0x66   : > { %1384 = shalt.err (!%p1381_p5)
}
  0x67   : > { %1173 = dma.hbm_to_vmem [thread:$0]  (!%p1750_p10), %s2054_s7, 256, %s392_s11, [#allocation12], %s2108_s28, %s2108_s28, %s2107_s22  }
  0x68   : > { %s419_s12 = scalar_lea.hbm %s2047_s0, %s1796_s8  ;;  %s412_s3 = scalar_lea.vmem [#allocation2], %s1793_s16 }
  0x69   : > { %s421_s30 = sshll.u32 %s412_s3, 4  ;;  %s2111_s14 = sand.u32 1, %s1585_s19   ;;  %s422_s30 = int_to_ptr.vmem [resolvable:$true] %s421_s30 }
  0x6a   : > { %s409_s13 = scalar_lea.sflag [#allocation3], %s2111_s14  ;;  %s1398_s1 = scalar_lea.vmem %s422_s30, 64 }
  0x6b   : > { %p1399_p7 = scmp.ne.s32.totalorder %s422_s30, %s1398_s1  ;;  %p2112_p12 = pneg %p1798_p0 }
  0x6c   : > { %s1613_s26 = smov [#allocation2]  }
  0x6d   : > { %p1401_p13 = pnand %p1399_p7, %p2112_p12  ;;  %s1403_s17 = sshll.u32 %s1613_s26, 4  ;;  %s1404_s17 = int_to_ptr.vmem [resolvable:$false] %s1403_s17 }
  0x6e   : > { %s1405_s5 = scalar_lea.vmem %s1404_s17, 128  ;;  %p1406_p10 = scmp.lt.s32.totalorder %s422_s30, %s1404_s17 }
  0x6f   : > { %p1402_p2 = pneg %p1401_p13  ;;  %p1407_p1 = scmp.lt.s32.totalorder %s1405_s5, %s1398_s1 }
  0x71   : > { %p1408_p6 = por %p1407_p1, %p1406_p10 }
  0x73   : > { %p1409_p4 = pnand %p1408_p6, %p1402_p2 }
  0x75   : > { %1412 = shalt.err (!%p1409_p4)
}
  0x76   : > { %1177 = dma.hbm_to_vmem [thread:$0]  (!%p1798_p0), %s419_s12, 64, %s422_s30, %s409_s13  }
  0x77   : > { %s459_s11 = scalar_lea.hbm %s2049_s2, %s1796_s8  ;;  %s452_s23 = scalar_lea.vmem [#allocation7], %s1793_s16 }
  0x78   : > { %s461_s6 = sshll.u32 %s452_s23, 4  ;;  %p2113_p11 = pmov %p2112_p12  ;;  %s462_s6 = int_to_ptr.vmem [resolvable:$true] %s461_s6 }
  0x79   : > { %s1426_s3 = scalar_lea.vmem %s462_s6, 64  ;;  %s1614_s1 = smov [#allocation7]  }
  0x7a   : > { %p1427_p8 = scmp.ne.s32.totalorder %s462_s6, %s1426_s3  ;;  %s1431_s5 = sshll.u32 %s1614_s1, 4  ;;  %s1432_s5 = int_to_ptr.vmem [resolvable:$false] %s1431_s5 }
  0x7b   : > { %s1433_s14 = scalar_lea.vmem %s1432_s5, 128  ;;  %p1434_p5 = scmp.lt.s32.totalorder %s462_s6, %s1432_s5 }
  0x7c   : > { %p1429_p3 = pnand %p1427_p8, %p2113_p11  ;;  %p1435_p7 = scmp.lt.s32.totalorder %s1433_s14, %s1426_s3 }
  0x7e   : > { %p1430_p9 = pneg %p1429_p3  ;;  %p1436_p12 = por %p1435_p7, %p1434_p5 }
  0x80   : > { %p1437_p13 = pnand %p1436_p12, %p1430_p9 }
  0x82   : > { %1440 = shalt.err (!%p1437_p13)
}
  0x83   : > { %1183 = dma.hbm_to_vmem [thread:$0]  (!%p1798_p0), %s459_s11, 64, %s462_s6, %s1811_s15  }
  0x84   : > { %p2114_p2 = scmp.ne.s32.totalorder %s2096_s29, 0 }
  0x85   : > { %s1869_s8 = sand.u32 (!%p2114_p2), 1, %s1581_s18   ;;  %p2115_p10 = scmp.ne.s32.totalorder (!%p2114_p2), %s2093_s27, 0 }
  0x86   : > { %470 = sbr.rel (%p2114_p2) target bundleno = 414 (0x19e), region = 56  ;;  %s1872_s16 = sshll.u32 (!%p2114_p2), %s1869_s8, 2 }
  0x87   : > { %s473_s12 = scalar_lea.sflag (!%p2114_p2), [#allocation3], %s1869_s8  ;;  %s476_s30 = scalar_lea.vmem (!%p2114_p2), [#allocation2], %s1872_s16 }
  0x8b   : > { %1552 = dma.done.wait (%p2115_p10), %s473_s12, 64  }
  0x8c   : > { %1554 = vsyncadd (%p2115_p10), %s473_s12, 4294967232  ;;  %s481_s9 = sand.u32 1, %s1721_s25   ;;  %s485_s15 = scalar_lea.vmem [#allocation5], %s1872_s16 }
  0x8d   : > { %s482_s29 = scalar_lea.sflag [#allocation6], %s481_s9 }
  0x8e   : > { %1556 = dma.done.wait (%p2115_p10), %s482_s29, 128  }
  0x8f   : > { %1558 = vsyncadd (%p2115_p10), %s482_s29, 4294967168  ;;  %s494_s13 = scalar_lea.vmem [#allocation7], %s1872_s16  ;;  %p2116_p0 = scmp.eq.s32.totalorder %s1721_s25, 0 }
  0x91   : > { %1560 = dma.done.wait (%p2116_p0), [#allocation9], 512   ;;  %p2117_p1 = pmov %p2116_p0 }
  0x92   : > { %p2118_p6 = pmov %p2116_p0 }
  0x93   : > { %1562 = vsyncadd (%p2117_p1), [#allocation9], 4294966784 }
  0x94   : > { %1564 = dma.done.wait (%p2118_p6), [#allocation12], 256   ;;  %p2119_p4 = pmov %p2116_p0 }
  0x95   : > { %v1615_v0 = vmov 0.0   ;;  %vm1616_vm0 = vmmov 0   ;;  %v1273_v1 = vld [vmem:[#allocation8 + $0x8] sm:$0xff]   ;;  %v1274_v2 = vld [vmem:[#allocation10 + $0x8] sm:$0xff]   ;;  %v1275_v3 = vld [vmem:[#allocation8] sm:$0xff]   ;;  %vm590_vm1 = vcmask 261120  }
  0x96   : > { %1566 = vsyncadd (%p2119_p4), [#allocation12], 4294967040  ;;  %1116 = vmatprep.subr.bf16.mxu0 %v1615_v0  ;;  %1124 = vmatprep.subr.bf16.mxu1 %v1615_v0  ;;  %v1276_v4 = vld [vmem:[#allocation10] sm:$0xff]   ;;  %v566_v5 = vld [vmem:[%s476_s30] sm:$0xf]  ;;  %s1099_s27 = sshll.u32 %s1593_s21, 1 }
  0x97   : > { %1120 = vmatprep.mubr.msk.bf16.mxu0 %vm1616_vm0, %v1615_v0  ;;  %1128 = vmatprep.mubr.msk.bf16.mxu1 %vm1616_vm0, %v1615_v0  ;;  %v1277_v6 = vld [vmem:[#allocation11 + $0x8] sm:$0xff]   ;;  %v638_v7 = vld [vmem:[%s485_s15] sm:$0xf]  ;;  %v1278_v8 = vld [vmem:[#allocation11] sm:$0xff]   ;;  %s798_s26 = sadd.s32 %s1589_s20, %s1099_s27  ;;  %s2120_s23 = sld [smem:[#allocation33_spill]]  ;;  %vm636_vm2 = vcmask 257024  }
  0x98   : > { %1117 = vmatpush3.bf16.msra.mxu0 %v1273_v1  ;;  %1125 = vmatpush3.bf16.msra.mxu1 %v1274_v2  ;;  %v707_v9 = vld [vmem:[%s494_s13] sm:$0xf]  ;;  %v1084_v10 = vld [vmem:[%s2051_s4] ss:$0 sm:$0xff]  ;;  %s1910_s6 = sshll.u32 %s798_s26, 6  ;;  %s557_s3 = scalar_lea.vmem [#allocation14], %s1872_s16 }
  0x99   : > { %1118 = vmatprep.subr.bf16.mxu0 %v1615_v0  ;;  %1126 = vmatprep.subr.bf16.mxu1 %v1615_v0  ;;  %s817_s1 = sshll.u32 %s557_s3, 4  ;;  %s550_s20 = scalar_lea.vmem [#allocation13], %s1872_s16  ;;  %s1922_s1 = int_to_ptr.vmem [resolvable:$true] %s817_s1 }
  0x9a   : > { %s802_s21 = sshll.u32 %s550_s20, 4  ;;  %s2121_s12 = sld [smem:[#allocation36_spill]]  ;;  %s1930_s21 = int_to_ptr.vmem [resolvable:$true] %s802_s21 }
  0x9b   : > { %s2122_s29 = sld [smem:[#allocation28_spill]]  ;;  %s564_s11 = scalar_lea.vmem [#allocation16], %s1872_s16 }
  0x9c   : > { %1119 = vmatpush3.bf16.msra.mxu0 %v1275_v3  ;;  %1127 = vmatpush3.bf16.msra.mxu1 %v1276_v4  ;;  %s2123_s27 = sld [smem:[#allocation35_spill]]  ;;  %s1943_s5 = scalar_lea.sflag [#allocation15], %s481_s9 }
  0x9d   : > { %1132 = vmatprep.subr.bf16.mxu0 %v1615_v0  ;;  %v1088_v11 = vld [vmem:[%s2120_s23] ss:$0 sm:$0xff]  ;;  %s2124_s28 = sld [smem:[#allocation34_spill]]  ;;  %s1939_s23 = sshll.u32 %s564_s11, 4  ;;  %s833_s23 = int_to_ptr.vmem [resolvable:$true] %s1939_s23 }
  0x9e   : > { %s1441_s14 = scalar_lea.vmem %s1922_s1, 64  ;;  %s1617_s15 = smov [#allocation14]  }
  0x9f   : > { %1121 = vmatmul.mubr.msk.bf16.vlgmr.msra.gmra.mxu0 %vm590_vm1, %v566_v5  ;;  %1129 = vmatmul.mubr.msk.bf16.vlgmr.msra.gmra.mxu1 %vm590_vm1, %v638_v7  ;;  %p1442_p8 = scmp.ne.s32.totalorder %s1922_s1, %s1441_s14  ;;  %s1445_s13 = sshll.u32 %s1617_s15, 4  ;;  %s1446_s13 = int_to_ptr.vmem [resolvable:$false] %s1445_s13 }
  0xa0   : > { %1133 = vmatpush3.bf16.msra.mxu0 %v1277_v6  ;;  %1136 = vmatprep.mubr.msk.bf16.mxu0 %vm1616_vm0, %v1615_v0  ;;  %s1920_s30 = scalar_lea.hbm %s2121_s12, %s1910_s6  ;;  %s1447_s17 = scalar_lea.vmem %s1446_s13, 128 }
  0xa1   : > { %1134 = vmatprep.subr.bf16.mxu0 %v1615_v0  ;;  %p2125_p11 = scmp.ne.s32.totalorder %s2122_s29, 0  ;;  %p1448_p5 = scmp.lt.s32.totalorder %s1922_s1, %s1446_s13 }
  0xa2   : > { %s1928_s26 = scalar_lea.hbm %s2123_s27, %s1910_s6  ;;  %p1449_p7 = scmp.lt.s32.totalorder %s1447_s17, %s1441_s14 }
  0xa3   : > { %v1092_v24 = vld [vmem:[%s2124_s28] ss:$0 sm:$0xff]  ;;  %p1443_p3 = pnand %p1442_p8, %p2125_p11 }
  0xa4   : > { %1135 = vmatpush3.bf16.msra.mxu0 %v1278_v8  ;;  %p1450_p12 = por %p1449_p7, %p1448_p5 }
  0xa5   : > { %p1444_p9 = pneg %p1443_p3 }
  0xa7   : > { %1137 = vmatmul.mubr.msk.bf16.vlgmr.msra.gmra.mxu0 %vm590_vm1, %v707_v9  ;;  %p1451_p13 = pnand %p1450_p12, %p1444_p9 }
 0x15f   : > { %v628_v12 = vpop.f32.mrf.mxu0  ;;  %v699_v14 = vpop.f32.mrf.mxu1 }
 0x160   : > { %v629_v13 = vadd.f32 %v1084_v10, %v628_v12  ;;  %v700_v16 = vadd.f32 %v1088_v11, %v699_v14 }
 0x161   : > { %v1122_v15 = vpop.f32.mrf.mxu0  ;;  %v1130_v18 = vpop.f32.mrf.mxu1 }
 0x162   : > { %v634_v17 = vmul.f32 0.35355338, %v629_v13  ;;  %v705_v19 = vpack.c.bf16 %v700_v16, %v700_v16 }
 0x163   : > { %v631_v20 = vpop.f32.mrf.mxu0  ;;  %v702_v22 = vpop.f32.mrf.mxu1 }
 0x164   : > { %v635_v21 = vpack.c.bf16 %v634_v17, %v634_v17  ;;  %706 = vst.msk [vmem:[%s557_s3] sm:$0xf] %vm636_vm2, %v705_v19 }
 0x165   : > { %v1123_v23 = vpop.f32.mrf.mxu0  ;;  %v1131_v25 = vpop.f32.mrf.mxu1 }
 0x166   : > { %1454 = shalt.err (!%p1451_p13)
}
 0x167   : > { %s1455_s25 = scalar_lea.hbm %s1920_s30, 64  ;;  %s1459_s22 = scalar_lea.hbm %s2121_s12, 256 }
 0x168   : > { %p1456_p2 = scmp.ne.s32.totalorder %s1920_s30, %s1455_s25  ;;  %p1460_p1 = scmp.lt.s32.totalorder %s1920_s30, %s2121_s12 }
 0x169   : > { %p1461_p6 = scmp.lt.s32.totalorder %s1459_s22, %s1455_s25 }
 0x16a   : > { %p1457_p10 = pnand %p1456_p2, %p2125_p11 }
 0x16b   : > { %p1462_p4 = por %p1461_p6, %p1460_p1 }
 0x16c   : > { %p1458_p0 = pneg %p1457_p10 }
 0x16e   : > { %p1463_p8 = pnand %p1462_p4, %p1458_p0 }
 0x170   : > { %1466 = shalt.err (!%p1463_p8)
}
 0x171   : > { %1159 = dma.vmem_to_hbm [thread:$0]  (%p2125_p11), %s1922_s1, 64, %s1920_s30, %s1943_s5   ;;  %637 = vst.msk [vmem:[%s550_s20] sm:$0xf] %vm636_vm2, %v635_v21  ;;  %v768_v26 = vpop.f32.mrf.mxu0 }
 0x172   : > { %s777_s14 = scalar_lea.sflag [#allocation4], %s1869_s8  ;;  %s1467_s13 = scalar_lea.vmem %s1930_s21, 64 }
 0x173   : > { %p1468_p3 = scmp.ne.s32.totalorder %s1930_s21, %s1467_s13  ;;  %s1618_s17 = smov [#allocation13]  }
 0x174   : > { %s1471_s25 = sshll.u32 %s1618_s17, 4  ;;  %s1472_s25 = int_to_ptr.vmem [resolvable:$false] %s1471_s25 }
 0x175   : > { %p1469_p9 = pnand %p1468_p3, %p2125_p11  ;;  %s1473_s9 = scalar_lea.vmem %s1472_s25, 128 }
 0x176   : > { %p1474_p7 = scmp.lt.s32.totalorder %s1930_s21, %s1472_s25  ;;  %p1475_p12 = scmp.lt.s32.totalorder %s1473_s9, %s1467_s13 }
 0x177   : > { %p1470_p5 = pneg %p1469_p9 }
 0x178   : > { %p1476_p13 = por %p1475_p12, %p1474_p7 }
 0x17a   : > { %p1477_p2 = pnand %p1476_p13, %p1470_p5 }
 0x17c   : > { %1480 = shalt.err (!%p1477_p2)
}
 0x17d   : > { %s1481_s1 = scalar_lea.hbm %s1928_s26, 64  ;;  %s1485_s30 = scalar_lea.hbm %s2123_s27, 256 }
 0x17e   : > { %p1482_p10 = scmp.ne.s32.totalorder %s1928_s26, %s1481_s1  ;;  %p1486_p6 = scmp.lt.s32.totalorder %s1928_s26, %s2123_s27 }
 0x17f   : > { %p1487_p4 = scmp.lt.s32.totalorder %s1485_s30, %s1481_s1 }
 0x180   : > { %p1483_p0 = pnand %p1482_p10, %p2125_p11 }
 0x181   : > { %p1488_p8 = por %p1487_p4, %p1486_p6 }
 0x182   : > { %p1484_p1 = pneg %p1483_p0 }
 0x184   : > { %p1489_p3 = pnand %p1488_p8, %p1484_p1 }
 0x186   : > { %1492 = shalt.err (!%p1489_p3)
}
 0x187   : > { %1158 = dma.vmem_to_hbm [thread:$0]  (%p2125_p11), %s1930_s21, 64, %s1928_s26, %s777_s14   ;;  %v769_v27 = vadd.f32 %v1092_v24, %v768_v26  ;;  %v1138_v28 = vpop.f32.mrf.mxu0 }
 0x188   : > { %s2126_s13 = sld [smem:[#allocation37_spill]]  ;;  %s1493_s25 = scalar_lea.vmem %s833_s23, 64 }
 0x189   : > { %v774_v29 = vpack.c.bf16 %v769_v27, %v769_v27  ;;  %v771_v30 = vpop.f32.mrf.mxu0  ;;  %p1494_p9 = scmp.ne.s32.totalorder %s833_s23, %s1493_s25  ;;  %s1619_s21 = smov [#allocation16]  }
 0x18a   : > { %s1497_s26 = sshll.u32 %s1619_s21, 4  ;;  %s1498_s26 = int_to_ptr.vmem [resolvable:$false] %s1497_s26 }
 0x18b   : > { %775 = vst.msk [vmem:[%s564_s11] sm:$0xf] %vm636_vm2, %v774_v29  ;;  %v1139_v31 = vpop.f32.mrf.mxu0  ;;  %p1495_p5 = pnand %p1494_p9, %p2125_p11  ;;  %s1499_s14 = scalar_lea.vmem %s1498_s26, 128 }
 0x18c   : > { %p1500_p12 = scmp.lt.s32.totalorder %s833_s23, %s1498_s26  ;;  %p1501_p13 = scmp.lt.s32.totalorder %s1499_s14, %s1493_s25 }
 0x18d   : > { %p1496_p7 = pneg %p1495_p5 }
 0x18e   : > { %s1994_s17 = scalar_lea.hbm %s2126_s13, %s1910_s6  ;;  %p1502_p2 = por %p1501_p13, %p1500_p12 }
 0x190   : > { %p1503_p10 = pnand %p1502_p2, %p1496_p7 }
 0x192   : > { %1506 = shalt.err (!%p1503_p10)
}
 0x193   : > { %s1507_s16 = scalar_lea.hbm %s1994_s17, 64  ;;  %s1511_s9 = scalar_lea.hbm %s2126_s13, 256 }
 0x194   : > { %p1508_p0 = scmp.ne.s32.totalorder %s1994_s17, %s1507_s16  ;;  %p1512_p4 = scmp.lt.s32.totalorder %s1994_s17, %s2126_s13 }
 0x195   : > { %p1513_p8 = scmp.lt.s32.totalorder %s1511_s9, %s1507_s16 }
 0x196   : > { %p1509_p1 = pnand %p1508_p0, %p2125_p11 }
 0x197   : > { %p1514_p3 = por %p1513_p8, %p1512_p4 }
 0x198   : > { %p1510_p6 = pneg %p1509_p1 }
 0x19a   : > { %p1515_p9 = pnand %p1514_p3, %p1510_p6 }
 0x19c   : > { %1518 = shalt.err (!%p1515_p9)
}
 0x19d   : > { %1160 = dma.vmem_to_hbm [thread:$0]  (%p2125_p11), %s833_s23, 64, %s1994_s17, %s1943_s5  }
 0x19e PF: > { %s2127_s20 = sld [smem:[#allocation23_spill]]  ;;  %p1201_p5 = scmp.ge.s32.totalorder %s1605_s24, 2 }
 0x19f   : > { %s2128_s30 = sld [smem:[#allocation26_spill]] }
 0x1a4   : > { %s844_s3 = sand.u32 1, %s2127_s20  }
 0x1a5   : > { %p2129_p7 = scmp.ne.s32.totalorder %s2128_s30, 0  ;;  %s845_s22 = scalar_lea.sflag [#allocation4], %s844_s3 }
 0x1a7   : > { %p1185_p12 = pnand %p1201_p5, %p2129_p7 }
 0x1a9   : > { %p1186_p13 = pneg %p1185_p12 }
 0x1ab   : > { %1568 = dma.done.wait (%p1186_p13), %s845_s22, 64  }
 0x1ac   : > { %1570 = vsyncadd (%p1186_p13), %s845_s22, 4294967232  ;;  %s2130_s28 = sadd.s32 4294967294, %s1605_s24  }
 0x1ad   : > { %s853_s15 = sand.u32 1, %s2130_s28  }
 0x1ae   : > { %s854_s25 = scalar_lea.sflag [#allocation15], %s853_s15 }
 0x1af   : > { %1572 = dma.done.wait (%p1186_p13), %s854_s25, 128  }
 0x1b0   : > { %1574 = vsyncadd (%p1186_p13), %s854_s25, 4294967168  ;;  %s36_s24 = sadd.s32 1, %s1605_s24   ;;  %s2131_s20 = sld [smem:[#allocation24_spill]] }
 0x1b1   : > { %p33_p11 = scmp.ge.s32.totalorder %s36_s24, 6   ;;  %s2132_s21 = sld [smem:[#allocation25_spill]] }
 0x1b2   : > { %s2133_s22 = sld [smem:[#allocation27_spill]]  ;;  %s2135_s17 = smov %s1581_s18 }
 0x1b3   : > { %s2134_s23 = sld [smem:[#allocation29_spill]]  ;;  %s2136_s18 = smov %s1585_s19 }
 0x1b4   : > { %s2137_s19 = smov %s1804_s10  ;;  %35 = sbr.rel (!%p33_p11) target bundleno = 22 (0x16), region = 169 }
 0x1b9   :  { %868 = vsyncpa [#allocation3], 1 }
 0x1ba   :  { %870 = vsyncpa [#allocation3 + $0x1], 1 }
 0x1bb   :  { %871 = vsyncpa [#allocation6], 1 }
 0x1bc   :  { %873 = vsyncpa [#allocation6 + $0x1], 1 }
 0x1bd   :  { %874 = vsyncpa [#allocation9], 1 }
 0x1be   :  { %875 = vsyncpa [#allocation12], 1 }
 0x1bf   :  { %876 = vsyncpa [#allocation4], 1 }
 0x1c0   :  { %878 = vsyncpa [#allocation4 + $0x1], 1 }
 0x1c1   :  { %879 = vsyncpa [#allocation15], 1 }
 0x1c2   :  { %881 = vsyncpa [#allocation15 + $0x1], 1 }

</bundles_post_ra>
